<compile_context>
chip_gen: v7x
topology: tpu7x:2x2x1
jax: 0.10.0
libtpu: 0.0.40
codegen_flags: <defaults>
</compile_context>

<pallas_src>
import functools
import math

import jax
import jax.numpy as jnp
from jax.experimental import pallas as pl
from jax.experimental.pallas import tpu as pltpu


def _pe_dropout_kernel(seed_ref, x_ref, pe_ref, o_ref, *,
                       keep_threshold, inv_keep, tile_s, apply_dropout):
    # x_ref: (TS, B, D), pe_ref: (TS, 1, D) -> broadcast add over the batch axis.
    y = x_ref[...] + pe_ref[...]
    if apply_dropout:
        ts, b, d = x_ref.shape
        # Global element index (independent of the tiling), then a cheap
        # integer mixer -> pseudo-uniform uint32.  Keep iff hash >= p * 2^32,
        # i.e. keep probability (1 - p); kept values scaled by 1/(1 - p).
        row0 = pl.program_id(0) * tile_s
        s_idx = jax.lax.broadcasted_iota(jnp.int32, (ts, b, d), 0) + row0
        b_idx = jax.lax.broadcasted_iota(jnp.int32, (ts, b, d), 1)
        d_idx = jax.lax.broadcasted_iota(jnp.int32, (ts, b, d), 2)
        idx = (s_idx * b + b_idx) * d + d_idx
        h = idx.astype(jnp.uint32) ^ seed_ref[0].astype(jnp.uint32)
        # lowbias32-style finalizer (Wang/Murmur family): xor-shift + mul rounds.
        h = h ^ (h >> 16)
        h = h * jnp.uint32(0x7FEB352D)
        h = h ^ (h >> 15)
        h = h * jnp.uint32(0x846CA68B)
        h = h ^ (h >> 16)
        keep = h >= jnp.uint32(keep_threshold)        # uint32 threshold compare (no f32 convert)
        y = jnp.where(keep, y * jnp.asarray(inv_keep, y.dtype), jnp.zeros_like(y))
    o_ref[...] = y


def make_positional_encoding(max_len, d_model):
    """Deterministic pe buffer, same formula as the PyTorch __init__."""
    position = jnp.arange(max_len, dtype=jnp.float32)[:, None]                 # (L, 1)
    div_term = jnp.exp(
        jnp.arange(0, d_model, 2, dtype=jnp.float32) * (-math.log(10000.0) / d_model)
    )                                                                          # (ceil(D/2),)
    angles = position * div_term                                               # (L, ceil(D/2))
    pe = jnp.zeros((max_len, d_model), dtype=jnp.float32)
    pe = pe.at[:, 0::2].set(jnp.sin(angles))
    pe = pe.at[:, 1::2].set(jnp.cos(angles[:, : d_model // 2]))                # odd d_model safe
    return pe[:, None, :]                                                      # (L, 1, D)


def _choose_tile_s(S, B, D, itemsize, vmem_budget_bytes=24 * 1024 * 1024):
    # Resident bytes per sequence row: x tile + out tile + (small) pe tile,
    # times 2 for the double-buffered pipeline.  A ~24 MiB working set keeps the
    # same tile choice safe on v5e/v6e (128 MiB VMEM) and v7x (64 MiB VMEM)
    # while keeping per-step overhead (~0.35 us) negligible.
    bytes_per_row = 2 * ((2 * B * D) + D) * itemsize
    ts = max(1, vmem_budget_bytes // max(1, bytes_per_row))
    ts = min(int(ts), S)
    if ts >= 8:
        ts = (ts // 8) * 8
    return ts


def positional_encoding_forward(x, pe, *, p=0.1, seed=0, training=True):
    """x: (S, B, D);  pe: (max_len, 1, D).  Returns dropout(x + pe[:S])."""
    S, B, D = x.shape
    assert 0.0 <= float(p) < 1.0, "dropout p must be in [0, 1)"
    apply_dropout = bool(training) and float(p) > 0.0

    pe_s = pe[:S].astype(x.dtype)                    # (S, 1, D); cast once, read once per call
    seed_arr = jnp.asarray([seed], dtype=jnp.int32)  # scalar seed lives in SMEM

    itemsize = jnp.dtype(x.dtype).itemsize
    ts = _choose_tile_s(S, B, D, itemsize)
    grid = (pl.cdiv(S, ts),)

    kernel = functools.partial(
        _pe_dropout_kernel,
        keep_threshold=int(round(float(p) * 2.0 ** 32)) & 0xFFFFFFFF,
        inv_keep=(1.0 / (1.0 - float(p))) if apply_dropout else 1.0,
        tile_s=ts,
        apply_dropout=apply_dropout,
    )

    # Truthful memory-bound cost for the XLA scheduler: read x + pe, write out.
    bytes_accessed = (2 * S * B * D + S * D) * itemsize

    return pl.pallas_call(
        kernel,
        out_shape=jax.ShapeDtypeStruct((S, B, D), x.dtype),
        grid=grid,
        in_specs=[
            pl.BlockSpec(memory_space=pltpu.MemorySpace.SMEM),        # seed (scalar)
            pl.BlockSpec((ts, B, D), lambda i: (i, 0, 0)),            # x tile
            pl.BlockSpec((ts, 1, D), lambda i: (i, 0, 0)),            # pe tile (broadcast over B in VMEM)
        ],
        out_specs=pl.BlockSpec((ts, B, D), lambda i: (i, 0, 0)),
        compiler_params=pltpu.CompilerParams(
            dimension_semantics=("parallel",),        # shard the S axis across TCs (v7x megacore)
            vmem_limit_bytes=48 * 1024 * 1024,        # > scoped default, < v7x 64 MiB physical
        ),
        cost_estimate=pl.CostEstimate(
            flops=S * B * D, transcendentals=0, bytes_accessed=bytes_accessed),
    )(seed_arr, x, pe_s)


if __name__ == "__main__":
    # Small shapes consistent with the module's forward: x [seq_len, batch, d_model].
    S, B, D = 8, 2, 32
    MAX_LEN = 64

    key = jax.random.PRNGKey(0)
    x = jax.random.normal(key, (S, B, D), dtype=jnp.float32)
    pe = make_positional_encoding(MAX_LEN, D)

    # Training-mode forward (dropout p=0.1, stateless in-kernel mask).
    out_train = positional_encoding_forward(x, pe, p=0.1, seed=0, training=True)
    jax.block_until_ready(out_train)
    assert out_train.shape == (S, B, D)

    # Kept elements equal (x + pe) * 1/(1-p); dropped elements are exactly 0.
    base = (x + pe[:S]) * jnp.float32(1.0 / (1.0 - 0.1))
    kept = out_train != 0.0
    assert jnp.allclose(jnp.where(kept, out_train, base), base, atol=1e-5)

    # Eval-mode forward (dropout is identity) -> must equal x + pe[:S].
    out_eval = positional_encoding_forward(x, pe, p=0.1, seed=0, training=False)
    jax.block_until_ready(out_eval)
    assert out_eval.shape == (S, B, D)
    assert jnp.allclose(out_eval, x + pe[:S], atol=1e-6), "eval-mode mismatch"

    print("KERNEL_OK")
</pallas_src>

<mosaic_0001>
module attributes {stable_mosaic.version = 11 : i64} {
  func.func @_pe_dropout_kernel(%arg0: i32, %arg1: memref<1xi32, #tpu.memory_space<smem>>, %arg2: memref<8x2x32xf32, #tpu.memory_space<vmem>>, %arg3: memref<8x1x32xf32, #tpu.memory_space<vmem>>, %arg4: memref<8x2x32xf32, #tpu.memory_space<vmem>>) attributes {dimension_semantics = [#tpu.dimension_semantics<parallel>], iteration_bounds = array<i64: 1>, scalar_prefetch = 0 : i64, scratch_operands = 0 : i64, tpu.core_type = #tpu.core_type<tc>, window_params = [{transform_indices = @transform_0, window_bounds = array<i64: 1>}, {transform_indices = @transform_1, window_bounds = array<i64: 8, 2, 32>}, {transform_indices = @transform_2, window_bounds = array<i64: 8, 1, 32>}, {transform_indices = @transform_3, window_bounds = array<i64: 8, 2, 32>}]} {
    %c0 = arith.constant 0 : index
    %c0_0 = arith.constant 0 : index
    %c0_1 = arith.constant 0 : index
    %0 = vector.load %arg2[%c0, %c0_0, %c0_1] : memref<8x2x32xf32, #tpu.memory_space<vmem>>, vector<8x2x32xf32>
    %c0_2 = arith.constant 0 : index
    %c0_3 = arith.constant 0 : index
    %c0_4 = arith.constant 0 : index
    %1 = vector.load %arg3[%c0_2, %c0_3, %c0_4] : memref<8x1x32xf32, #tpu.memory_space<vmem>>, vector<8x1x32xf32>
    %2 = vector.broadcast %1 : vector<8x1x32xf32> to vector<8x2x32xf32>
    %3 = arith.addf %0, %2 : vector<8x2x32xf32>
    %c8_i32 = arith.constant 8 : i32
    %4 = arith.muli %arg0, %c8_i32 : i32
    %5 = tpu.iota {dimensions = array<i32: 0>} : vector<8x2x32xi32>
    %6 = vector.broadcast %4 : i32 to vector<8x2x32xi32>
    %7 = arith.addi %5, %6 : vector<8x2x32xi32>
    %8 = tpu.iota {dimensions = array<i32: 1>} : vector<8x2x32xi32>
    %9 = tpu.iota {dimensions = array<i32: 2>} : vector<8x2x32xi32>
    %c2_i32 = arith.constant 2 : i32
    %10 = vector.broadcast %c2_i32 : i32 to vector<8x2x32xi32>
    %11 = arith.muli %7, %10 : vector<8x2x32xi32>
    %12 = arith.addi %11, %8 : vector<8x2x32xi32>
    %c32_i32 = arith.constant 32 : i32
    %13 = vector.broadcast %c32_i32 : i32 to vector<8x2x32xi32>
    %14 = arith.muli %12, %13 : vector<8x2x32xi32>
    %15 = arith.addi %14, %9 : vector<8x2x32xi32>
    %c0_5 = arith.constant 0 : index
    %16 = memref.load %arg1[%c0_5] : memref<1xi32, #tpu.memory_space<smem>>
    %17 = vector.broadcast %16 : i32 to vector<8x2x32xi32>
    %18 = arith.xori %15, %17 : vector<8x2x32xi32>
    %c16_i32 = arith.constant 16 : i32
    %19 = vector.broadcast %c16_i32 : i32 to vector<8x2x32xi32>
    %20 = arith.shrui %18, %19 : vector<8x2x32xi32>
    %21 = arith.xori %18, %20 : vector<8x2x32xi32>
    %c2146121005_i32 = arith.constant 2146121005 : i32
    %22 = vector.broadcast %c2146121005_i32 : i32 to vector<8x2x32xi32>
    %23 = arith.muli %21, %22 : vector<8x2x32xi32>
    %c15_i32 = arith.constant 15 : i32
    %24 = vector.broadcast %c15_i32 : i32 to vector<8x2x32xi32>
    %25 = arith.shrui %23, %24 : vector<8x2x32xi32>
    %26 = arith.xori %23, %25 : vector<8x2x32xi32>
    %c-2073254261_i32 = arith.constant -2073254261 : i32
    %27 = vector.broadcast %c-2073254261_i32 : i32 to vector<8x2x32xi32>
    %28 = arith.muli %26, %27 : vector<8x2x32xi32>
    %c16_i32_6 = arith.constant 16 : i32
    %29 = vector.broadcast %c16_i32_6 : i32 to vector<8x2x32xi32>
    %30 = arith.shrui %28, %29 : vector<8x2x32xi32>
    %31 = arith.xori %28, %30 : vector<8x2x32xi32>
    %c429496730_i32 = arith.constant 429496730 : i32
    %32 = vector.broadcast %c429496730_i32 : i32 to vector<8x2x32xi32>
    %33 = arith.cmpi uge, %31, %32 : vector<8x2x32xi32>
    %cst = arith.constant 1.11111116 : f32
    %34 = vector.broadcast %cst : f32 to vector<8x2x32xf32>
    %35 = arith.mulf %3, %34 : vector<8x2x32xf32>
    %cst_7 = arith.constant 0.000000e+00 : f32
    %36 = vector.broadcast %cst_7 : f32 to vector<8x2x32xf32>
    %37 = arith.select %33, %35, %36 : vector<8x2x32xi1>, vector<8x2x32xf32>
    %c0_8 = arith.constant 0 : index
    %c0_9 = arith.constant 0 : index
    %c0_10 = arith.constant 0 : index
    %38 = vector.load %arg4[%c0_8, %c0_9, %c0_10] : memref<8x2x32xf32, #tpu.memory_space<vmem>>, vector<8x2x32xf32>
    tpu.vector_store %arg4[%c0_8, %c0_9, %c0_10], %37 {strides = array<i32>} : memref<8x2x32xf32, #tpu.memory_space<vmem>>, vector<8x2x32xf32>,
    return
  }
  func.func @transform_0(%arg0: i32) -> i32 {
    %c0_i32 = arith.constant 0 : i32
    %c0_i32_0 = arith.constant 0 : i32
    return %c0_i32 : i32
  }
  func.func @transform_1(%arg0: i32) -> (i32, i32, i32) {
    %c0_i32 = arith.constant 0 : i32
    %c0_i32_0 = arith.constant 0 : i32
    %c0_i32_1 = arith.constant 0 : i32
    return %arg0, %c0_i32, %c0_i32_0 : i32, i32, i32
  }
  func.func @transform_2(%arg0: i32) -> (i32, i32, i32) {
    %c0_i32 = arith.constant 0 : i32
    %c0_i32_0 = arith.constant 0 : i32
    %c0_i32_1 = arith.constant 0 : i32
    return %arg0, %c0_i32, %c0_i32_0 : i32, i32, i32
  }
  func.func @transform_3(%arg0: i32) -> (i32, i32, i32) {
    %c0_i32 = arith.constant 0 : i32
    %c0_i32_0 = arith.constant 0 : i32
    %c0_i32_1 = arith.constant 0 : i32
    return %arg0, %c0_i32, %c0_i32_0 : i32, i32, i32
  }
}

</mosaic_0001>

<bundles_post_ra>
// kernel: tpu_custom_call.1
= control target key start
LH: loop header
LB: loop body
LE: loop exit
PB: predicated region body
PF: predicated region fallthrough
CT: control target
= control target key end

     0   :  { %9 = vsyncpa [#allocation4], 0  ;;  %s473_s0 = inlined_call_operand.<no memory space> [shape: s32[1], index: 0, kind: input, shape index: {}]   ;;  %s474_s1 = inlined_call_operand.hbm [shape: f32[8,2,32], index: 1, kind: input, shape index: {}]   ;;  %s475_s2 = inlined_call_operand.hbm [shape: f32[8,1,32], index: 2, kind: input, shape index: {}]   ;;  %s476_s3 = inlined_call_operand.hbm [shape: f32[8,2,32], index: 3, kind: output, shape index: {}]  }
   0x1   :  { %10 = vsyncpa [#allocation7], 0 }
   0x2   :  { %11 = vsyncpa [#allocation5], 0  ;;  %s373_s12 = smov [#allocation3]   ;;  %s301_s16 = scalar_lea.hbm %s474_s1, 256 }
   0x3   :  { %s19_s13 = sshll.u32 %s373_s12, 4  ;;  %p302_p0 = scmp.ne.s32.totalorder %s474_s1, %s301_s16  ;;  %s20_s13 = int_to_ptr.vmem [resolvable:$true] %s19_s13 }
   0x4   :  { %p305_p1 = scmp.lt.u32.totalorder %s301_s16, %s474_s1 }
   0x6   :  { %p307_p2 = pnand %p305_p1, %p302_p0 }
   0x8   :  { %310 = shalt.err (!%p307_p2)
}
   0x9   :  { %s311_s21 = scalar_lea.vmem %s20_s13, 256  ;;  %p316_p4 = scmp.lt.s32.totalorder %s20_s13, %s20_s13 }
   0xa   :  { %p312_p3 = scmp.ne.s32.totalorder %s20_s13, %s311_s21  ;;  %p317_p5 = scmp.lt.s32.totalorder %s311_s21, %s311_s21 }
   0xc   :  { %p318_p6 = por %p317_p5, %p316_p4 }
   0xe   :  { %p319_p7 = pnand %p318_p6, %p312_p3 }
  0x10   :  { %322 = shalt.err (!%p319_p7)
}
  0x11   :  { %s374_s22 = smov 32   ;;  %s375_s23 = smov 2  }
  0x12   :  { %25 = dma.hbm_to_vmem [thread:$0]  %s474_s1, 256, %s20_s13, [#allocation4], %s374_s22, %s374_s22, %s375_s23  }
  0x13   :  { %s376_s26 = smov [#allocation6]   ;;  %s323_s30 = scalar_lea.hbm %s475_s2, 128 }
  0x14   :  { %s31_s27 = sshll.u32 %s376_s26, 4  ;;  %p324_p8 = scmp.ne.s32.totalorder %s475_s2, %s323_s30  ;;  %s32_s27 = int_to_ptr.vmem [resolvable:$true] %s31_s27 }
  0x15   :  { %p327_p9 = scmp.lt.u32.totalorder %s323_s30, %s475_s2 }
  0x17   :  { %p329_p10 = pnand %p327_p9, %p324_p8 }
  0x19   :  { %332 = shalt.err (!%p329_p10)
}
  0x1a   :  { %s333_s8 = scalar_lea.vmem %s32_s27, 128  ;;  %p338_p12 = scmp.lt.s32.totalorder %s32_s27, %s32_s27 }
  0x1b   :  { %p334_p11 = scmp.ne.s32.totalorder %s32_s27, %s333_s8  ;;  %p339_p13 = scmp.lt.s32.totalorder %s333_s8, %s333_s8 }
  0x1d   :  { %p340_p0 = por %p339_p13, %p338_p12 }
  0x1f   :  { %p341_p1 = pnand %p340_p0, %p334_p11 }
  0x21   :  { %344 = shalt.err (!%p341_p1)
}
  0x22   :  { %s377_s1 = smov 16   ;;  %s378_s9 = smov 1  }
  0x23   :  { %37 = dma.hbm_to_vmem [thread:$0]  %s475_s2, 128, %s32_s27, [#allocation7], %s377_s1, %s377_s1, %s378_s9  }
  0x24   :  { %367 = dma.done.wait [#allocation4], 256  }
  0x25   :  { %368 = vsyncadd [#allocation4], 4294967040 }
  0x26   :  { %369 = dma.done.wait [#allocation7], 128  }
  0x27   :  { %370 = vsyncadd [#allocation7], 4294967168  ;;  %v125_v0 = vlaneseq  ;;  %v432_v6 = vstv %s473_s0  ;;  %v44_v12 = vld [vmem:[#allocation3] sm:$0x3]  ;;  %v286_v13 = vld [vmem:[#allocation6] ss:$0 sm:$0xff] }
  0x28   :  { %v45_v15 = vld [vmem:[#allocation3 + $0x2] sm:$0x3]  ;;  %v287_v16 = vld [vmem:[#allocation6 + $0x1] ss:$0 sm:$0xff]  ;;  %v108_v21 = vadd.f32 %v286_v13, %v44_v12  ;;  %v46_v24 = vld [vmem:[#allocation3 + $0x4] sm:$0x3] }
  0x29   :  { %v126_v1 = vshrl.u32 %v125_v0, 7  ;;  %v427_v2 = vand.u32 127, %v125_v0  ;;  %v288_v25 = vld [vmem:[#allocation6 + $0x2] ss:$0 sm:$0xff]  ;;  %v109_v27 = vadd.f32 %v287_v16, %v45_v15  ;;  %v47_v35 = vld [vmem:[#allocation3 + $0x6] sm:$0x3] }
  0x2a   :  { %v110_v34 = vadd.f32 %v288_v25, %v46_v24  ;;  %v289_v36 = vld [vmem:[#allocation6 + $0x3] ss:$0 sm:$0xff]  ;;  %v243_v41 = vmul.f32 1.1111112, %v108_v21  ;;  %vm259_vm0 = vcmask 254976   ;;  %s379_s0 = smov [#allocation8]  }
  0x2b   :  { %v145_v3 = vmul.u32 32, %v126_v1  ;;  %v138_v4 = vadd.s32 2, %v126_v1  ;;  %v139_v5 = vadd.s32 4, %v126_v1  ;;  %v140_v7 = vadd.s32 6, %v126_v1  ;;  %v48_v61 = vld [vmem:[#allocation3 + $0x8] sm:$0x3] }
  0x2c   :  { %v141_v8 = vadd.s32 8, %v126_v1  ;;  %v142_v29 = vadd.s32 10, %v126_v1  ;;  %v143_v33 = vadd.s32 12, %v126_v1  ;;  %v144_v39 = vadd.s32 14, %v126_v1  ;;  %v290_v62 = vld [vmem:[#allocation6 + $0x4] ss:$0 sm:$0xff] }
  0x2d   :  { %v153_v9 = vadd.s32 %v145_v3, %v427_v2  ;;  %v146_v10 = vmul.u32 32, %v138_v4  ;;  %v147_v11 = vmul.u32 32, %v139_v5  ;;  %v244_v44 = vmul.f32 1.1111112, %v109_v27  ;;  %s273_s2 = sshll.u32 %s379_s0, 4  ;;  %s274_s2 = int_to_ptr.vmem [resolvable:$true] %s273_s2 }
  0x2e   :  { %v148_v19 = vmul.u32 32, %v140_v7  ;;  %v149_v20 = vmul.u32 32, %v141_v8  ;;  %v111_v51 = vadd.f32 %v289_v36, %v47_v35  ;;  %v245_v59 = vmul.f32 1.1111112, %v110_v34  ;;  %s345_s14 = scalar_lea.vmem %s274_s2, 256  ;;  %p350_p3 = scmp.lt.s32.totalorder %s274_s2, %s274_s2 }
  0x2f   :  { %v163_v14 = vxor.u32 %v432_v6, %v153_v9  ;;  %v154_v17 = vadd.s32 %v146_v10, %v427_v2  ;;  %v155_v18 = vadd.s32 %v147_v11, %v427_v2  ;;  %v150_v47 = vmul.u32 32, %v142_v29  ;;  %p346_p2 = scmp.ne.s32.totalorder %s274_s2, %s345_s14  ;;  %p351_p4 = scmp.lt.s32.totalorder %s345_s14, %s345_s14 }
  0x30   :  { %v156_v28 = vadd.s32 %v148_v19, %v427_v2  ;;  %v157_v38 = vadd.s32 %v149_v20, %v427_v2  ;;  %v151_v55 = vmul.u32 32, %v143_v33  ;;  %v246_v7 = vmul.f32 1.1111112, %v111_v51 }
  0x31   :  { %v171_v22 = vshrl.u32 %v163_v14, 16  ;;  %v164_v23 = vxor.u32 %v432_v6, %v154_v17  ;;  %v165_v26 = vxor.u32 %v432_v6, %v155_v18  ;;  %v158_v54 = vadd.s32 %v150_v47, %v427_v2  ;;  %p352_p5 = por %p351_p4, %p350_p3 }
  0x32   :  { %v166_v37 = vxor.u32 %v432_v6, %v156_v28  ;;  %v167_v46 = vxor.u32 %v432_v6, %v157_v38  ;;  %v159_v1 = vadd.s32 %v151_v55, %v427_v2  ;;  %v112_v15 = vadd.f32 %v290_v62, %v48_v61  ;;  %v51_v61 = vld [vmem:[#allocation3 + $0xe] sm:$0x3]  ;;  %v293_v62 = vld [vmem:[#allocation6 + $0x7] ss:$0 sm:$0xff] }
  0x33   :  { %v179_v30 = vxor.u32 %v171_v22, %v163_v14  ;;  %v172_v31 = vshrl.u32 %v164_v23, 16  ;;  %v173_v32 = vshrl.u32 %v165_v26, 16  ;;  %v168_v0 = vxor.u32 %v432_v6, %v158_v54  ;;  %p353_p6 = pnand %p352_p5, %p346_p2 }
  0x34   :  { %v174_v45 = vshrl.u32 %v166_v37, 16  ;;  %v175_v53 = vshrl.u32 %v167_v46, 16  ;;  %v169_v11 = vxor.u32 %v432_v6, %v159_v1 }
  0x35   :  { %v187_v40 = vmul.u32 2146121005, %v179_v30  ;;  %v180_v42 = vxor.u32 %v172_v31, %v164_v23  ;;  %v181_v43 = vxor.u32 %v173_v32, %v165_v26  ;;  %v176_v10 = vshrl.u32 %v168_v0, 16  ;;  %v49_v30 = vld [vmem:[#allocation3 + $0xa] sm:$0x3] }
  0x36   :  { %v182_v52 = vxor.u32 %v174_v45, %v166_v37  ;;  %v183_v63 = vxor.u32 %v175_v53, %v167_v46  ;;  %v177_v19 = vshrl.u32 %v169_v11, 16  ;;  %v152_v23 = vmul.u32 32, %v144_v39  ;;  %v291_v31 = vld [vmem:[#allocation6 + $0x5] ss:$0 sm:$0xff]  ;;  %v50_v45 = vld [vmem:[#allocation3 + $0xc] sm:$0x3] }
  0x37   :  { %v195_v48 = vshrl.u32 %v187_v40, 15  ;;  %v188_v49 = vmul.u32 2146121005, %v180_v42  ;;  %v189_v50 = vmul.u32 2146121005, %v181_v43  ;;  %v184_v18 = vxor.u32 %v176_v10, %v168_v0 }
  0x38   :  { %v190_v60 = vmul.u32 2146121005, %v182_v52  ;;  %v191_v9 = vmul.u32 2146121005, %v183_v63  ;;  %v185_v27 = vxor.u32 %v177_v19, %v169_v11  ;;  %v160_v32 = vadd.s32 %v152_v23, %v427_v2  ;;  %v292_v46 = vld [vmem:[#allocation6 + $0x6] ss:$0 sm:$0xff] }
  0x39   :  { %v203_v56 = vxor.u32 %v195_v48, %v187_v40  ;;  %v196_v57 = vshrl.u32 %v188_v49, 15  ;;  %v197_v58 = vshrl.u32 %v189_v50, 15  ;;  %v192_v26 = vmul.u32 2146121005, %v184_v18 }
  0x3a   :  { %v198_v8 = vshrl.u32 %v190_v60, 15  ;;  %v199_v17 = vshrl.u32 %v191_v9, 15  ;;  %v193_v37 = vmul.u32 2146121005, %v185_v27  ;;  %v170_v38 = vxor.u32 %v432_v6, %v160_v32 }
  0x3b   :  { %v211_v3 = vmul.u32 2221713035, %v203_v56  ;;  %v204_v4 = vxor.u32 %v196_v57, %v188_v49  ;;  %v205_v5 = vxor.u32 %v197_v58, %v189_v50  ;;  %v200_v36 = vshrl.u32 %v192_v26, 15 }
  0x3c   :  { %v206_v16 = vxor.u32 %v198_v8, %v190_v60  ;;  %v207_v25 = vxor.u32 %v199_v17, %v191_v9  ;;  %v247_v2 = vmul.f32 1.1111112, %v112_v15  ;;  %v201_v47 = vshrl.u32 %v193_v37, 15 }
  0x3d   :  { %v219_v12 = vshrl.u32 %v211_v3, 16  ;;  %v212_v13 = vmul.u32 2221713035, %v204_v4  ;;  %v213_v14 = vmul.u32 2221713035, %v205_v5  ;;  %v178_v48 = vshrl.u32 %v170_v38, 16 }
  0x3e   :  { %v214_v24 = vmul.u32 2221713035, %v206_v16  ;;  %v215_v35 = vmul.u32 2221713035, %v207_v25  ;;  %v113_v50 = vadd.f32 %v291_v31, %v49_v30  ;;  %v209_v6 = vxor.u32 %v201_v47, %v193_v37 }
  0x3f   :  { %v227_v20 = vxor.u32 %v219_v12, %v211_v3  ;;  %v220_v21 = vshrl.u32 %v212_v13, 16  ;;  %v221_v22 = vshrl.u32 %v213_v14, 16  ;;  %v114_v53 = vadd.f32 %v292_v46, %v50_v45 }
  0x40   :  { %v222_v34 = vshrl.u32 %v214_v24, 16  ;;  %v223_v43 = vshrl.u32 %v215_v35, 16  ;;  %v217_v56 = vmul.u32 2221713035, %v209_v6  ;;  %v248_v58 = vmul.f32 1.1111112, %v113_v50 }
  0x41   :  { %vm235_vm1 = vcmp.ge.u32.totalorder %v227_v20, 429496730  ;;  %v228_v28 = vxor.u32 %v220_v21, %v212_v13  ;;  %v229_v29 = vxor.u32 %v221_v22, %v213_v14  ;;  %v249_v0 = vmul.f32 1.1111112, %v114_v53 }
  0x42   :  { %v251_v33 = vsel %vm235_vm1, %v243_v41, 0.0  ;;  %v230_v42 = vxor.u32 %v222_v34, %v214_v24  ;;  %v208_v41 = vxor.u32 %v200_v36, %v192_v26  ;;  %v231_v49 = vxor.u32 %v223_v43, %v215_v35 }
  0x43   :  { %260 = vst.msk [vmem:[#allocation8] sm:$0x3] %vm259_vm0, %v251_v33  ;;  %vm236_vm2 = vcmp.ge.u32.totalorder %v228_v28, 429496730  ;;  %vm237_vm3 = vcmp.ge.u32.totalorder %v229_v29, 429496730  ;;  %v115_v5 = vadd.f32 %v293_v62, %v51_v61 }
  0x44   :  { %v252_v39 = vsel %vm236_vm2, %v244_v44, 0.0  ;;  %v253_v40 = vsel %vm237_vm3, %v245_v59, 0.0  ;;  %vm238_vm4 = vcmp.ge.u32.totalorder %v230_v42, 429496730  ;;  %v216_v52 = vmul.u32 2221713035, %v208_v41 }
  0x45   :  { %261 = vst.msk [vmem:[#allocation8 + $0x2] sm:$0x3] %vm259_vm0, %v252_v39  ;;  %262 = vst.msk [vmem:[#allocation8 + $0x4] sm:$0x3] %vm259_vm0, %v253_v40  ;;  %v254_v51 = vsel %vm238_vm4, %v246_v7, 0.0  ;;  %v186_v44 = vxor.u32 %v178_v48, %v170_v38  ;;  %v225_v60 = vshrl.u32 %v217_v56, 16 }
  0x46   :  { %263 = vst.msk [vmem:[#allocation8 + $0x6] sm:$0x3] %vm259_vm0, %v254_v51  ;;  %vm239_vm5 = vcmp.ge.u32.totalorder %v231_v49, 429496730  ;;  %v224_v55 = vshrl.u32 %v216_v52, 16 }
  0x47   :  { %v255_v54 = vsel %vm239_vm5, %v247_v2, 0.0  ;;  %v194_v57 = vmul.u32 2146121005, %v186_v44  ;;  %v233_v1 = vxor.u32 %v225_v60, %v217_v56  ;;  %v250_v10 = vmul.f32 1.1111112, %v115_v5 }
  0x48   :  { %264 = vst.msk [vmem:[#allocation8 + $0x8] sm:$0x3] %vm259_vm0, %v255_v54  ;;  %v232_v59 = vxor.u32 %v224_v55, %v216_v52 }
  0x49   :  { %v202_v63 = vshrl.u32 %v194_v57, 15  ;;  %vm241_vm7 = vcmp.ge.u32.totalorder %v233_v1, 429496730 }
  0x4a   :  { %vm240_vm6 = vcmp.ge.u32.totalorder %v232_v59, 429496730  ;;  %v257_v8 = vsel %vm241_vm7, %v249_v0, 0.0 }
  0x4b   :  { %v210_v3 = vxor.u32 %v202_v63, %v194_v57  ;;  %v256_v4 = vsel %vm240_vm6, %v248_v58, 0.0  ;;  %266 = vst.msk [vmem:[#allocation8 + $0xc] sm:$0x3] %vm259_vm0, %v257_v8 }
  0x4c   :  { %265 = vst.msk [vmem:[#allocation8 + $0xa] sm:$0x3] %vm259_vm0, %v256_v4 }
  0x4d   :  { %v218_v7 = vmul.u32 2221713035, %v210_v3 }
  0x4f   :  { %v226_v9 = vshrl.u32 %v218_v7, 16 }
  0x51   :  { %v234_v11 = vxor.u32 %v226_v9, %v218_v7 }
  0x53   :  { %vm242_vm8 = vcmp.ge.u32.totalorder %v234_v11, 429496730 }
  0x54   :  { %v258_v12 = vsel %vm242_vm8, %v250_v10, 0.0 }
  0x55   :  { %267 = vst.msk [vmem:[#allocation8 + $0xe] sm:$0x3] %vm259_vm0, %v258_v12 }
  0x56   :  { %356 = shalt.err (!%p353_p6)
}
  0x57   :  { %s357_s17 = scalar_lea.hbm %s476_s3, 256 }
  0x58   :  { %p358_p7 = scmp.ne.s32.totalorder %s476_s3, %s357_s17  ;;  %p361_p8 = scmp.lt.u32.totalorder %s357_s17, %s476_s3 }
  0x5a   :  { %p363_p9 = pnand %p361_p8, %p358_p7 }
  0x5c   :  { %366 = shalt.err (!%p363_p9)
}
  0x5d   :  { %279 = dma.vmem_to_hbm [thread:$0]  %s274_s2, 256, %s476_s3, [#allocation5], %s374_s22, %s374_s22, %s375_s23  }
  0x5e   :  { %371 = dma.done.wait [#allocation5], 256  }
  0x5f   :  { %372 = vsyncadd [#allocation5], 4294967040 }
  0x60   :  { %283 = vsyncpa [#allocation4], 1 }
  0x61   :  { %284 = vsyncpa [#allocation7], 1 }
  0x62   :  { %285 = vsyncpa [#allocation5], 1 }

</bundles_post_ra>
